<compile_context>
chip_gen: v6e
topology: v6e:2x2x1
jax: 0.10.0
libtpu: 0.0.40
codegen_flags: <defaults>
</compile_context>

<pallas_src>
import numpy as np
import jax
import jax.numpy as jnp
from jax import lax
from jax.experimental import pallas as pl
from jax.experimental.pallas import tpu as pltpu

_EPS = 1e-5


# ---------------------------------------------------------------------------
# Fused kernel: expand 1x1 (+BN1,ReLU) -> 3x3 depthwise (+BN2,ReLU)
#               -> project 1x1 (+BN3) -> (+ residual), all in VMEM.
# Layout: activations are (channel, pixel) with pixel = window_row * Wp + col.
# ---------------------------------------------------------------------------
def _make_block_kernel(*, Wp, tile_pix, has_sc_conv, add_residual):
    def kernel(x_ref, m_ref, w1_ref, b1_ref, w2_ref, b2_ref, w3_ref, b3_ref,
               *rest):
        if has_sc_conv:
            wsc_ref, bsc_ref, o_ref = rest
        else:
            (o_ref,) = rest

        xw = x_ref[...]                                  # (Cin, win_pix) f32
        xw_bf = xw.astype(jnp.bfloat16)

        # -- expand 1x1 conv (BN1 scale folded into w1) + bias + ReLU --------
        h = jnp.dot(w1_ref[...], xw_bf,
                    preferred_element_type=jnp.float32)  # (planes, win_pix)
        h = jnp.maximum(h + b1_ref[...], 0.0)
        # Zero the pixels that are conv2's spatial zero-padding.  (The BN1
        # bias + ReLU makes them nonzero after the expand step otherwise.)
        h = h * m_ref[...]

        # -- 3x3 depthwise conv (BN2 folded) + bias + ReLU -------------------
        # In the flattened (channel, pixel) layout, tap (kh, kw) is a static
        # lane shift by kh*Wp + kw: 9 shifted slices, pure VPU/XLU work.
        w2 = w2_ref[...]                                 # (planes, 9) f32
        acc = h[:, 0:tile_pix] * w2[:, 0:1]
        for kh in range(3):
            for kw in range(3):
                t = kh * 3 + kw
                if t == 0:
                    continue
                off = kh * Wp + kw
                acc = acc + h[:, off:off + tile_pix] * w2[:, t:t + 1]
        y = jnp.maximum(acc + b2_ref[...], 0.0)          # (planes, tile_pix)

        # -- project 1x1 conv (BN3 folded) + bias ----------------------------
        out = jnp.dot(w3_ref[...], y.astype(jnp.bfloat16),
                      preferred_element_type=jnp.float32) + b3_ref[...]

        # -- residual ---------------------------------------------------------
        if add_residual:
            lo = Wp + 1                                  # centre (non-halo) px
            if has_sc_conv:
                out = out + (jnp.dot(wsc_ref[...], xw_bf[:, lo:lo + tile_pix],
                                     preferred_element_type=jnp.float32)
                             + bsc_ref[...])
            else:
                out = out + xw[:, lo:lo + tile_pix]      # identity shortcut

        o_ref[...] = out.astype(o_ref.dtype)

    return kernel


# ---------------------------------------------------------------------------
# Wrapper glue: BN folding, window/layout prep, pallas_call
# ---------------------------------------------------------------------------
def _fold_bn(p):
    s = p["gamma"] * lax.rsqrt(p["var"] + _EPS)
    return s, p["beta"] - p["mean"] * s


def _pick_row_tile(H, Wp, planes, budget_bytes=2 << 20):
    # Largest divisor of H whose expanded window (planes x win_pix, f32) fits
    # the per-step budget (actual working set is a few x this: taps + acc).
    for th in range(H, 0, -1):
        if H % th == 0 and planes * (th + 3) * Wp * 4 <= budget_bytes:
            return th
    return 1


def block_forward(x_nchw, params, stride):
    N, Cin, H, W = x_nchw.shape
    planes = params["w1"].shape[1]
    Cout = params["w3"].shape[1]

    # Fold eval-mode BN into the conv weights.  1x1-conv weights go to bf16
    # (MXU operands, transposed for channel-major matmuls); the depthwise
    # weights stay f32 (VPU math).
    s1, b1 = _fold_bn(params["bn1"])
    s2, b2 = _fold_bn(params["bn2"])
    s3, b3 = _fold_bn(params["bn3"])
    w1t = (params["w1"].T * s1[:, None]).astype(jnp.bfloat16)     # (planes, Cin)
    w2 = params["w2"].reshape(9, planes).T * s2[:, None]          # (planes, 9)
    w3t = (params["w3"].T * s3[:, None]).astype(jnp.bfloat16)     # (Cout, planes)

    add_residual = stride == 1
    has_sc_conv = add_residual and ("w_sc" in params)
    if add_residual and not has_sc_conv:
        assert Cin == Cout, "identity shortcut requires in_planes == out_planes"

    # Row tiling of the (stride-1) depthwise.  The 1-row halo is handled by
    # overlapping per-tile windows cut here in the wrapper (whole rows only),
    # so the kernel uses static offsets exclusively.
    Wp = W + 2
    th = _pick_row_tile(H, Wp, planes)
    n_tiles = H // th
    tile_pix = th * Wp
    win_rows = th + 3                     # th output rows + 2 halo + 1 tail row
    win_pix = win_rows * Wp

    Hp = H + 3                            # 1 top pad + 2 bottom pad rows
    xp = jnp.pad(x_nchw, ((0, 0), (0, 0), (1, 2), (1, 1)))        # (N,Cin,Hp,Wp)
    # TODO(synk): halo rows are duplicated across tiles in HBM (~(th+3)/th x
    # input bytes when n_tiles > 1); negligible vs. the expanded intermediate.
    xwin = jnp.stack([xp[:, :, i * th:i * th + win_rows, :]
                      for i in range(n_tiles)], axis=1)
    xwin = xwin.reshape(N, n_tiles, Cin, win_pix)

    # Mask of "real" (non zero-padding) pixels for each tile window.
    row_ok = (jnp.arange(Hp) >= 1) & (jnp.arange(Hp) <= H)
    col_ok = (jnp.arange(Wp) >= 1) & (jnp.arange(Wp) <= W)
    maskp = (row_ok[:, None] & col_ok[None, :]).astype(jnp.float32)
    mwin = jnp.stack([maskp[i * th:i * th + win_rows, :]
                      for i in range(n_tiles)], axis=0)
    mwin = mwin.reshape(n_tiles, 1, win_pix)

    kernel = _make_block_kernel(Wp=Wp, tile_pix=tile_pix,
                                has_sc_conv=has_sc_conv,
                                add_residual=add_residual)

    def wspec(shp):
        return pl.BlockSpec(shp, lambda n, i: (0,) * len(shp))

    in_specs = [
        pl.BlockSpec((None, None, Cin, win_pix), lambda n, i: (n, i, 0, 0)),
        pl.BlockSpec((None, 1, win_pix), lambda n, i: (i, 0, 0)),
        wspec((planes, Cin)), wspec((planes, 1)),
        wspec((planes, 9)), wspec((planes, 1)),
        wspec((Cout, planes)), wspec((Cout, 1)),
    ]
    args = [xwin, mwin,
            w1t, b1.reshape(planes, 1),
            w2, b2.reshape(planes, 1),
            w3t, b3.reshape(Cout, 1)]
    if has_sc_conv:
        ssc, bsc = _fold_bn(params["bn_sc"])
        in_specs += [wspec((Cout, Cin)), wspec((Cout, 1))]
        args += [(params["w_sc"].T * ssc[:, None]).astype(jnp.bfloat16),
                 bsc.reshape(Cout, 1)]

    out = pl.pallas_call(
        kernel,
        out_shape=jax.ShapeDtypeStruct((N, n_tiles, Cout, tile_pix),
                                       x_nchw.dtype),
        grid=(N, n_tiles),
        in_specs=in_specs,
        out_specs=pl.BlockSpec((None, None, Cout, tile_pix),
                               lambda n, i: (n, i, 0, 0)),
        compiler_params=pltpu.CompilerParams(
            dimension_semantics=("parallel", "parallel"),
            vmem_limit_bytes=32 * 1024 * 1024),
    )(*args)

    # Assemble NCHW output (no-op transpose when n_tiles == 1); drop the two
    # junk columns coming from the left/right zero padding.
    out = out.reshape(N, n_tiles, Cout, th, Wp)
    out = jnp.transpose(out, (0, 2, 1, 3, 4)).reshape(N, Cout, H, Wp)
    out = out[:, :, :, :W]
    if stride != 1:
        # TODO(synk): stride>1 is computed at stride-1 resolution and then
        # subsampled (correct, ~stride^2 extra depthwise/project work); a
        # strided fused variant would avoid the waste.
        out = out[:, :, ::stride, ::stride]
    return out


# ---------------------------------------------------------------------------
# Deterministic parameter init (shapes from Block.__init__)
# ---------------------------------------------------------------------------
def init_params(key, in_planes, out_planes, expansion, stride):
    planes = expansion * in_planes
    ks = jax.random.split(key, 8)

    def conv_w(k, cin, cout):
        return jax.random.normal(k, (cin, cout), jnp.float32) * 0.1

    def bn(k, c):
        k1, k2, k3, k4 = jax.random.split(k, 4)
        return dict(
            gamma=jax.random.uniform(k1, (c,), jnp.float32, 0.5, 1.5),
            beta=jax.random.normal(k2, (c,), jnp.float32) * 0.1,
            mean=jax.random.normal(k3, (c,), jnp.float32) * 0.1,
            var=jax.random.uniform(k4, (c,), jnp.float32, 0.5, 1.5),
        )

    params = dict(
        w1=conv_w(ks[0], in_planes, planes),                             # 1x1 expand
        bn1=bn(ks[1], planes),
        w2=jax.random.normal(ks[2], (3, 3, planes), jnp.float32) * 0.1,  # depthwise
        bn2=bn(ks[3], planes),
        w3=conv_w(ks[4], planes, out_planes),                            # 1x1 project
        bn3=bn(ks[5], out_planes),
    )
    if stride == 1 and in_planes != out_planes:
        params["w_sc"] = conv_w(ks[6], in_planes, out_planes)
        params["bn_sc"] = bn(ks[7], out_planes)
    return params


# ---------------------------------------------------------------------------
# Pure-JAX reference (for correctness check only)
# ---------------------------------------------------------------------------
def reference_forward(x_nchw, params, stride):
    x = jnp.transpose(x_nchw, (0, 2, 3, 1))
    dn = ("NHWC", "HWIO", "NHWC")

    def bn_apply(y, p):
        s = p["gamma"] / jnp.sqrt(p["var"] + _EPS)
        return y * s + (p["beta"] - p["mean"] * s)

    planes = params["w1"].shape[1]
    h = lax.conv_general_dilated(
        x, params["w1"].reshape(1, 1, *params["w1"].shape), (1, 1), "VALID",
        dimension_numbers=dn)
    h = jax.nn.relu(bn_apply(h, params["bn1"]))
    h = lax.conv_general_dilated(
        h, params["w2"].reshape(3, 3, 1, planes), (stride, stride),
        ((1, 1), (1, 1)), dimension_numbers=dn, feature_group_count=planes)
    h = jax.nn.relu(bn_apply(h, params["bn2"]))
    h = lax.conv_general_dilated(
        h, params["w3"].reshape(1, 1, *params["w3"].shape), (1, 1), "VALID",
        dimension_numbers=dn)
    h = bn_apply(h, params["bn3"])
    if stride == 1:
        if "w_sc" in params:
            sc = lax.conv_general_dilated(
                x, params["w_sc"].reshape(1, 1, *params["w_sc"].shape), (1, 1),
                "VALID", dimension_numbers=dn)
            sc = bn_apply(sc, params["bn_sc"])
        else:
            sc = x
        h = h + sc
    return jnp.transpose(h, (0, 3, 1, 2))


# ---------------------------------------------------------------------------
if __name__ == "__main__":
    key = jax.random.PRNGKey(0)
    kx, kp = jax.random.split(key)

    # Block(in_planes=4, out_planes=8, expansion=4, stride=1)
    in_planes, out_planes, expansion, stride = 4, 8, 4, 1
    N, H, W = 2, 16, 16

    x = jax.random.normal(kx, (N, in_planes, H, W), jnp.float32)   # NCHW input
    params = init_params(kp, in_planes, out_planes, expansion, stride)

    out = block_forward(x, params, stride)
    out = jax.block_until_ready(out)

    assert out.shape == (N, out_planes, H, W), out.shape
    ref = reference_forward(x, params, stride)
    # Tolerance covers the bf16 MXU inputs (f32 accumulation) used in the kernel.
    np.testing.assert_allclose(np.asarray(out), np.asarray(ref),
                               rtol=2e-2, atol=2e-2)
    print("KERNEL_OK")
</pallas_src>

<mosaic_0001>
module attributes {stable_mosaic.version = 11 : i64} {
  func.func @kernel(%arg0: i32, %arg1: i32, %arg2: memref<1x1x4x342xf32, #tpu.memory_space<vmem>>, %arg3: memref<1x1x342xf32, #tpu.memory_space<vmem>>, %arg4: memref<16x4xbf16, #tpu.memory_space<vmem>>, %arg5: memref<16x1xf32, #tpu.memory_space<vmem>>, %arg6: memref<16x9xf32, #tpu.memory_space<vmem>>, %arg7: memref<16x1xf32, #tpu.memory_space<vmem>>, %arg8: memref<8x16xbf16, #tpu.memory_space<vmem>>, %arg9: memref<8x1xf32, #tpu.memory_space<vmem>>, %arg10: memref<8x4xbf16, #tpu.memory_space<vmem>>, %arg11: memref<8x1xf32, #tpu.memory_space<vmem>>, %arg12: memref<1x1x8x288xf32, #tpu.memory_space<vmem>>) attributes {dimension_semantics = [#tpu.dimension_semantics<parallel>, #tpu.dimension_semantics<parallel>], iteration_bounds = array<i64: 2, 1>, scalar_prefetch = 0 : i64, scratch_operands = 0 : i64, tpu.core_type = #tpu.core_type<tc>, window_params = [{transform_indices = @transform_0, window_bounds = array<i64: 1, 1, 4, 342>}, {transform_indices = @transform_1, window_bounds = array<i64: 1, 1, 342>}, {pipeline_mode = #tpu.pipeline_mode<synchronous>, transform_indices = @transform_2, window_bounds = array<i64: 16, 4>}, {pipeline_mode = #tpu.pipeline_mode<synchronous>, transform_indices = @transform_3, window_bounds = array<i64: 16, 1>}, {pipeline_mode = #tpu.pipeline_mode<synchronous>, transform_indices = @transform_4, window_bounds = array<i64: 16, 9>}, {pipeline_mode = #tpu.pipeline_mode<synchronous>, transform_indices = @transform_5, window_bounds = array<i64: 16, 1>}, {pipeline_mode = #tpu.pipeline_mode<synchronous>, transform_indices = @transform_6, window_bounds = array<i64: 8, 16>}, {pipeline_mode = #tpu.pipeline_mode<synchronous>, transform_indices = @transform_7, window_bounds = array<i64: 8, 1>}, {pipeline_mode = #tpu.pipeline_mode<synchronous>, transform_indices = @transform_8, window_bounds = array<i64: 8, 4>}, {pipeline_mode = #tpu.pipeline_mode<synchronous>, transform_indices = @transform_9, window_bounds = array<i64: 8, 1>}, {transform_indices = @transform_10, window_bounds = array<i64: 1, 1, 8, 288>}]} {
    %c0 = arith.constant 0 : index
    %c0_0 = arith.constant 0 : index
    %c0_1 = arith.constant 0 : index
    %c0_2 = arith.constant 0 : index
    %0 = vector.load %arg2[%c0, %c0_0, %c0_1, %c0_2] : memref<1x1x4x342xf32, #tpu.memory_space<vmem>>, vector<1x1x4x342xf32>
    %1 = vector.shape_cast %0 : vector<1x1x4x342xf32> to vector<4x342xf32>
    %2 = arith.truncf %1 : vector<4x342xf32> to vector<4x342xbf16>
    %c0_3 = arith.constant 0 : index
    %c0_4 = arith.constant 0 : index
    %3 = vector.load %arg4[%c0_3, %c0_4] : memref<16x4xbf16, #tpu.memory_space<vmem>>, vector<16x4xbf16>
    %cst = arith.constant dense<0.000000e+00> : vector<16x342xf32>
    %4 = tpu.matmul %3, %2, %cst {dimension_numbers = #tpu.dot_dimension_numbers<[1], [0], [0], [1], [0, 0, 1, 1], [], []>} : vector<16x4xbf16>, vector<4x342xbf16>, vector<16x342xf32> -> vector<16x342xf32>
    %c0_5 = arith.constant 0 : index
    %c0_6 = arith.constant 0 : index
    %5 = vector.load %arg5[%c0_5, %c0_6] : memref<16x1xf32, #tpu.memory_space<vmem>>, vector<16x1xf32>
    %6 = vector.broadcast %5 : vector<16x1xf32> to vector<16x342xf32>
    %7 = arith.addf %4, %6 : vector<16x342xf32>
    %cst_7 = arith.constant 0.000000e+00 : f32
    %8 = vector.broadcast %cst_7 : f32 to vector<16x342xf32>
    %9 = arith.maximumf %7, %8 : vector<16x342xf32>
    %c0_8 = arith.constant 0 : index
    %c0_9 = arith.constant 0 : index
    %c0_10 = arith.constant 0 : index
    %10 = vector.load %arg3[%c0_8, %c0_9, %c0_10] : memref<1x1x342xf32, #tpu.memory_space<vmem>>, vector<1x1x342xf32>
    %11 = vector.shape_cast %10 : vector<1x1x342xf32> to vector<1x342xf32>
    %12 = vector.broadcast %11 : vector<1x342xf32> to vector<16x342xf32>
    %13 = arith.mulf %9, %12 : vector<16x342xf32>
    %c0_11 = arith.constant 0 : index
    %c0_12 = arith.constant 0 : index
    %14 = vector.load %arg6[%c0_11, %c0_12] : memref<16x9xf32, #tpu.memory_space<vmem>>, vector<16x9xf32>
    %15 = vector.extract_strided_slice %13 {offsets = [0, 0], sizes = [16, 288], strides = [1, 1]} : vector<16x342xf32> to vector<16x288xf32>
    %16 = vector.extract_strided_slice %14 {offsets = [0, 0], sizes = [16, 1], strides = [1, 1]} : vector<16x9xf32> to vector<16x1xf32>
    %17 = vector.broadcast %16 : vector<16x1xf32> to vector<16x288xf32>
    %18 = arith.mulf %15, %17 : vector<16x288xf32>
    %19 = vector.extract_strided_slice %13 {offsets = [0, 1], sizes = [16, 288], strides = [1, 1]} : vector<16x342xf32> to vector<16x288xf32>
    %20 = vector.extract_strided_slice %14 {offsets = [0, 1], sizes = [16, 1], strides = [1, 1]} : vector<16x9xf32> to vector<16x1xf32>
    %21 = vector.broadcast %20 : vector<16x1xf32> to vector<16x288xf32>
    %22 = arith.mulf %19, %21 : vector<16x288xf32>
    %23 = arith.addf %18, %22 : vector<16x288xf32>
    %24 = vector.extract_strided_slice %13 {offsets = [0, 2], sizes = [16, 288], strides = [1, 1]} : vector<16x342xf32> to vector<16x288xf32>
    %25 = vector.extract_strided_slice %14 {offsets = [0, 2], sizes = [16, 1], strides = [1, 1]} : vector<16x9xf32> to vector<16x1xf32>
    %26 = vector.broadcast %25 : vector<16x1xf32> to vector<16x288xf32>
    %27 = arith.mulf %24, %26 : vector<16x288xf32>
    %28 = arith.addf %23, %27 : vector<16x288xf32>
    %29 = vector.extract_strided_slice %13 {offsets = [0, 18], sizes = [16, 288], strides = [1, 1]} : vector<16x342xf32> to vector<16x288xf32>
    %30 = vector.extract_strided_slice %14 {offsets = [0, 3], sizes = [16, 1], strides = [1, 1]} : vector<16x9xf32> to vector<16x1xf32>
    %31 = vector.broadcast %30 : vector<16x1xf32> to vector<16x288xf32>
    %32 = arith.mulf %29, %31 : vector<16x288xf32>
    %33 = arith.addf %28, %32 : vector<16x288xf32>
    %34 = vector.extract_strided_slice %13 {offsets = [0, 19], sizes = [16, 288], strides = [1, 1]} : vector<16x342xf32> to vector<16x288xf32>
    %35 = vector.extract_strided_slice %14 {offsets = [0, 4], sizes = [16, 1], strides = [1, 1]} : vector<16x9xf32> to vector<16x1xf32>
    %36 = vector.broadcast %35 : vector<16x1xf32> to vector<16x288xf32>
    %37 = arith.mulf %34, %36 : vector<16x288xf32>
    %38 = arith.addf %33, %37 : vector<16x288xf32>
    %39 = vector.extract_strided_slice %13 {offsets = [0, 20], sizes = [16, 288], strides = [1, 1]} : vector<16x342xf32> to vector<16x288xf32>
    %40 = vector.extract_strided_slice %14 {offsets = [0, 5], sizes = [16, 1], strides = [1, 1]} : vector<16x9xf32> to vector<16x1xf32>
    %41 = vector.broadcast %40 : vector<16x1xf32> to vector<16x288xf32>
    %42 = arith.mulf %39, %41 : vector<16x288xf32>
    %43 = arith.addf %38, %42 : vector<16x288xf32>
    %44 = vector.extract_strided_slice %13 {offsets = [0, 36], sizes = [16, 288], strides = [1, 1]} : vector<16x342xf32> to vector<16x288xf32>
    %45 = vector.extract_strided_slice %14 {offsets = [0, 6], sizes = [16, 1], strides = [1, 1]} : vector<16x9xf32> to vector<16x1xf32>
    %46 = vector.broadcast %45 : vector<16x1xf32> to vector<16x288xf32>
    %47 = arith.mulf %44, %46 : vector<16x288xf32>
    %48 = arith.addf %43, %47 : vector<16x288xf32>
    %49 = vector.extract_strided_slice %13 {offsets = [0, 37], sizes = [16, 288], strides = [1, 1]} : vector<16x342xf32> to vector<16x288xf32>
    %50 = vector.extract_strided_slice %14 {offsets = [0, 7], sizes = [16, 1], strides = [1, 1]} : vector<16x9xf32> to vector<16x1xf32>
    %51 = vector.broadcast %50 : vector<16x1xf32> to vector<16x288xf32>
    %52 = arith.mulf %49, %51 : vector<16x288xf32>
    %53 = arith.addf %48, %52 : vector<16x288xf32>
    %54 = vector.extract_strided_slice %13 {offsets = [0, 38], sizes = [16, 288], strides = [1, 1]} : vector<16x342xf32> to vector<16x288xf32>
    %55 = vector.extract_strided_slice %14 {offsets = [0, 8], sizes = [16, 1], strides = [1, 1]} : vector<16x9xf32> to vector<16x1xf32>
    %56 = vector.broadcast %55 : vector<16x1xf32> to vector<16x288xf32>
    %57 = arith.mulf %54, %56 : vector<16x288xf32>
    %58 = arith.addf %53, %57 : vector<16x288xf32>
    %c0_13 = arith.constant 0 : index
    %c0_14 = arith.constant 0 : index
    %59 = vector.load %arg7[%c0_13, %c0_14] : memref<16x1xf32, #tpu.memory_space<vmem>>, vector<16x1xf32>
    %60 = vector.broadcast %59 : vector<16x1xf32> to vector<16x288xf32>
    %61 = arith.addf %58, %60 : vector<16x288xf32>
    %cst_15 = arith.constant 0.000000e+00 : f32
    %62 = vector.broadcast %cst_15 : f32 to vector<16x288xf32>
    %63 = arith.maximumf %61, %62 : vector<16x288xf32>
    %c0_16 = arith.constant 0 : index
    %c0_17 = arith.constant 0 : index
    %64 = vector.load %arg8[%c0_16, %c0_17] : memref<8x16xbf16, #tpu.memory_space<vmem>>, vector<8x16xbf16>
    %65 = arith.truncf %63 : vector<16x288xf32> to vector<16x288xbf16>
    %cst_18 = arith.constant dense<0.000000e+00> : vector<8x288xf32>
    %66 = tpu.matmul %64, %65, %cst_18 {dimension_numbers = #tpu.dot_dimension_numbers<[1], [0], [0], [1], [0, 0, 1, 1], [], []>} : vector<8x16xbf16>, vector<16x288xbf16>, vector<8x288xf32> -> vector<8x288xf32>
    %c0_19 = arith.constant 0 : index
    %c0_20 = arith.constant 0 : index
    %67 = vector.load %arg9[%c0_19, %c0_20] : memref<8x1xf32, #tpu.memory_space<vmem>>, vector<8x1xf32>
    %68 = vector.broadcast %67 : vector<8x1xf32> to vector<8x288xf32>
    %69 = arith.addf %66, %68 : vector<8x288xf32>
    %c0_21 = arith.constant 0 : index
    %c0_22 = arith.constant 0 : index
    %70 = vector.load %arg10[%c0_21, %c0_22] : memref<8x4xbf16, #tpu.memory_space<vmem>>, vector<8x4xbf16>
    %71 = vector.extract_strided_slice %2 {offsets = [0, 19], sizes = [4, 288], strides = [1, 1]} : vector<4x342xbf16> to vector<4x288xbf16>
    %cst_23 = arith.constant dense<0.000000e+00> : vector<8x288xf32>
    %72 = tpu.matmul %70, %71, %cst_23 {dimension_numbers = #tpu.dot_dimension_numbers<[1], [0], [0], [1], [0, 0, 1, 1], [], []>} : vector<8x4xbf16>, vector<4x288xbf16>, vector<8x288xf32> -> vector<8x288xf32>
    %c0_24 = arith.constant 0 : index
    %c0_25 = arith.constant 0 : index
    %73 = vector.load %arg11[%c0_24, %c0_25] : memref<8x1xf32, #tpu.memory_space<vmem>>, vector<8x1xf32>
    %74 = vector.broadcast %73 : vector<8x1xf32> to vector<8x288xf32>
    %75 = arith.addf %72, %74 : vector<8x288xf32>
    %76 = arith.addf %69, %75 : vector<8x288xf32>
    %c0_26 = arith.constant 0 : index
    %c0_27 = arith.constant 0 : index
    %c0_28 = arith.constant 0 : index
    %c0_29 = arith.constant 0 : index
    %77 = vector.load %arg12[%c0_26, %c0_27, %c0_28, %c0_29] : memref<1x1x8x288xf32, #tpu.memory_space<vmem>>, vector<1x1x8x288xf32>
    %78 = vector.shape_cast %77 : vector<1x1x8x288xf32> to vector<8x288xf32>
    %79 = vector.shape_cast %76 : vector<8x288xf32> to vector<1x1x8x288xf32>
    tpu.vector_store %arg12[%c0_26, %c0_27, %c0_28, %c0_29], %79 {strides = array<i32>} : memref<1x1x8x288xf32, #tpu.memory_space<vmem>>, vector<1x1x8x288xf32>,
    return
  }
  func.func @transform_0(%arg0: i32, %arg1: i32) -> (i32, i32, i32, i32) {
    %c0_i32 = arith.constant 0 : i32
    %c0_i32_0 = arith.constant 0 : i32
    %c0_i32_1 = arith.constant 0 : i32
    return %arg0, %arg1, %c0_i32, %c0_i32_0 : i32, i32, i32, i32
  }
  func.func @transform_1(%arg0: i32, %arg1: i32) -> (i32, i32, i32) {
    %c0_i32 = arith.constant 0 : i32
    %c0_i32_0 = arith.constant 0 : i32
    %c0_i32_1 = arith.constant 0 : i32
    return %arg1, %c0_i32, %c0_i32_0 : i32, i32, i32
  }
  func.func @transform_2(%arg0: i32, %arg1: i32) -> (i32, i32) {
    %c0_i32 = arith.constant 0 : i32
    %c0_i32_0 = arith.constant 0 : i32
    %c0_i32_1 = arith.constant 0 : i32
    return %c0_i32, %c0_i32_0 : i32, i32
  }
  func.func @transform_3(%arg0: i32, %arg1: i32) -> (i32, i32) {
    %c0_i32 = arith.constant 0 : i32
    %c0_i32_0 = arith.constant 0 : i32
    %c0_i32_1 = arith.constant 0 : i32
    return %c0_i32, %c0_i32_0 : i32, i32
  }
  func.func @transform_4(%arg0: i32, %arg1: i32) -> (i32, i32) {
    %c0_i32 = arith.constant 0 : i32
    %c0_i32_0 = arith.constant 0 : i32
    %c0_i32_1 = arith.constant 0 : i32
    return %c0_i32, %c0_i32_0 : i32, i32
  }
  func.func @transform_5(%arg0: i32, %arg1: i32) -> (i32, i32) {
    %c0_i32 = arith.constant 0 : i32
    %c0_i32_0 = arith.constant 0 : i32
    %c0_i32_1 = arith.constant 0 : i32
    return %c0_i32, %c0_i32_0 : i32, i32
  }
  func.func @transform_6(%arg0: i32, %arg1: i32) -> (i32, i32) {
    %c0_i32 = arith.constant 0 : i32
    %c0_i32_0 = arith.constant 0 : i32
    %c0_i32_1 = arith.constant 0 : i32
    return %c0_i32, %c0_i32_0 : i32, i32
  }
  func.func @transform_7(%arg0: i32, %arg1: i32) -> (i32, i32) {
    %c0_i32 = arith.constant 0 : i32
    %c0_i32_0 = arith.constant 0 : i32
    %c0_i32_1 = arith.constant 0 : i32
    return %c0_i32, %c0_i32_0 : i32, i32
  }
  func.func @transform_8(%arg0: i32, %arg1: i32) -> (i32, i32) {
    %c0_i32 = arith.constant 0 : i32
    %c0_i32_0 = arith.constant 0 : i32
    %c0_i32_1 = arith.constant 0 : i32
    return %c0_i32, %c0_i32_0 : i32, i32
  }
  func.func @transform_9(%arg0: i32, %arg1: i32) -> (i32, i32) {
    %c0_i32 = arith.constant 0 : i32
    %c0_i32_0 = arith.constant 0 : i32
    %c0_i32_1 = arith.constant 0 : i32
    return %c0_i32, %c0_i32_0 : i32, i32
  }
  func.func @transform_10(%arg0: i32, %arg1: i32) -> (i32, i32, i32, i32) {
    %c0_i32 = arith.constant 0 : i32
    %c0_i32_0 = arith.constant 0 : i32
    %c0_i32_1 = arith.constant 0 : i32
    return %arg0, %arg1, %c0_i32, %c0_i32_0 : i32, i32, i32, i32
  }
}

</mosaic_0001>

<bundles_post_ra>
// kernel: tpu_custom_call.1
= control target key start
LH: loop header
LB: loop body
LE: loop exit
PB: predicated region body
PF: predicated region fallthrough
CT: control target
= control target key end

     0   :  { %s2096_s0 = inlined_call_operand.vmem [shape: f32[2,1,4,342], index: 0, kind: input, shape index: {}]   ;;  %s2097_s1 = inlined_call_operand.vmem [shape: f32[1,1,342], index: 1, kind: input, shape index: {}]   ;;  %s2098_s2 = inlined_call_operand.vmem [shape: bf16[16,4], index: 2, kind: input, shape index: {}]   ;;  %s2099_s3 = inlined_call_operand.vmem [shape: f32[16,1], index: 3, kind: input, shape index: {}]   ;;  %s2100_s4 = inlined_call_operand.vmem [shape: f32[16,9], index: 4, kind: input, shape index: {}]   ;;  %s2101_s5 = inlined_call_operand.vmem [shape: f32[16,1], index: 5, kind: input, shape index: {}]   ;;  %s2102_s6 = inlined_call_operand.vmem [shape: bf16[8,16], index: 6, kind: input, shape index: {}]   ;;  %s2103_s7 = inlined_call_operand.vmem [shape: f32[8,1], index: 7, kind: input, shape index: {}]   ;;  %s2104_s8 = inlined_call_operand.vmem [shape: bf16[8,4], index: 8, kind: input, shape index: {}]   ;;  %s2105_s9 = inlined_call_operand.vmem [shape: f32[8,1], index: 9, kind: input, shape index: {}]   ;;  %s2106_s10 = inlined_call_operand.hbm [shape: f32[2,1,8,288], index: 10, kind: output, shape index: {}]  }
   0x1   :  { %2107 = sst [smem:[#allocation5_spill]] %s2096_s0 }
   0x2   :  { %15 = vsyncpa [#allocation3], 0 }
   0x3   :  { %17 = vsyncpa [#allocation3 + $0x1], 0  ;;  %s1607_s13 = smov 0   ;;  %s1609_s14 = smov 0  }
   0x4   :  { %s1611_s15 = smov 0   ;;  %s1613_s16 = smov 0  }
   0x5   :  { %s1615_s17 = smov 0   ;;  %s1617_s18 = smov 0  }
   0x6 LB: > { %s1317_s19 = sadd.s32 4294967295, %s1530_s18   ;;  %s1318_s20 = sadd.s32 4294967294, %s1530_s18   ;;  %s1530_s18 = sphi %s1617_s18, %s23_s18   ;;  %s1526_s17 = sphi %s1615_s17, %s2115_s17   ;;  %s1522_s16 = sphi %s1613_s16, %s2114_s16   ;;  %s1518_s15 = sphi %s1611_s15, %s2113_s15   ;;  %s1514_s14 = sphi %s1609_s14, %s2112_s14   ;;  %s1510_s13 = sphi %s1607_s13, %s2111_s13  }
   0x7   : > { %s35_s21 = sadd.s32 1, %s1526_s17  ;;  %s266_s22 = sadd.s32 1, %s1518_s15 }
   0x8   : > { %p37_p0 = scmp.ge.s32.totalorder %s35_s21, 2  ;;  %p276_p1 = scmp.ne.s32.totalorder %s1518_s15, %s1514_s14 }
   0x9   : > { %p277_p2 = scmp.eq.s32.totalorder %s1317_s19, 1  ;;  %p282_p3 = scmp.ne.s32.totalorder %s1514_s14, %s1510_s13 }
   0xa   : > { %s2117_s21 = smov (%p37_p0, %s35_s21), 0  ;;  %p283_p5 = scmp.eq.s32.totalorder %s1318_s20, 1 }
   0xb   : > { %p1647_p4 = por %p277_p2, %p276_p1  ;;  %s261_s24 = ssub.s32 %s1526_s17, %s2117_s21 }
   0xc   : > { %p1322_p6 = scmp.ge.s32.totalorder %s1530_s18, 1  ;;  %p264_p7 = scmp.eq.s32.totalorder %s261_s24, 0 }
   0xd   : > { %p1654_p8 = por %p283_p5, %p282_p3  ;;  %p344_p9 = scmp.lt.s32.totalorder %s1530_s18, 3 }
   0xe   : > { %s1660_s26 = scalar_select %p264_p7, %s1518_s15, %s266_s22  }
   0xf   : > { %p345_p10 = pnand %p1322_p6, %p344_p9 }
  0x10   : > { %p390_p11 = scmp.lt.s32.totalorder (!%p345_p10), %s1522_s16, 1  ;;  %s2110_s0 = sld [smem:[#allocation5_spill]] (!%p345_p10) }
  0x11   : > { %348 = sbr.rel (%p345_p10) target bundleno = 678 (0x2a6), region = 60  ;;  %s1543_s28 = smov (!%p345_p10), 127  }
  0x12   : > { %s1544_s29 = smov (!%p345_p10), 126   ;;  %s1546_s11 = smov (!%p345_p10), 109  }
  0x13   : > { %s1547_s12 = smov (!%p345_p10), 108   ;;  %s1548_s19 = smov (!%p345_p10), 92  }
  0x14   : > { %s1549_s20 = smov (!%p345_p10), 91  }
  0x16   : > { %v1532_v0 = vmov 0.0   ;;  %vm1533_vm0 = vmmov 0   ;;  %s391_s27 = scalar_select %p390_p11, %s1522_s16, 1  ;;  %v1534_v1 = vmov 0   ;;  %v1535_v2 = vmov 1   ;;  %v1671_v3 = vld [vmem:[%s2100_s4] sm:$0xff] }
  0x17   : > { %1342 = vmatprep.subr.bf16.mxu1 %v1532_v0  ;;  %1344 = vmatprep.mubr.msk.bf16.mxu1 %vm1533_vm0, %v1532_v0  ;;  %v1536_v4 = vmov 2   ;;  %v559_v5 = vld [vmem:[%s2100_s4 + $0x8] sm:$0xff]  ;;  %vm435_vm1 = vcmask 1041408   ;;  %v1537_v11 = vmov 3   ;;  %v1453_v15 = vld [vmem:[%s2098_s2] sm:$0xff]   ;;  %vm431_vm2 = vcmask 31744  }
  0x18   : > { %477 = vmatprep.mubr.bf16.mxu0 %v1534_v1  ;;  %1437 = vset.pattern.permute.xlu1 %v1535_v2  ;;  %s1361_s30 = smul.u32 12, %s391_s27  ;;  %v1538_v16 = vmov 5   ;;  %v1539_v17 = vmov 6   ;;  %v1540_v18 = vmov 4   ;;  %v1541_v19 = vmov 8   ;;  %v414_v20 = vld [vmem:[%s2099_s3] sm:$0xff] }
  0x19   : > { %577 = vperm.xlu1 %1437, %v1671_v3   ;;  %1438 = vset.pattern.permute.xlu0 %v1536_v4  ;;  %v415_v21 = vld [vmem:[%s2099_s3 + $0x8] sm:$0xff]  ;;  %v968_v22 = vld [vmem:[%s2101_s5] sm:$0xff]  ;;  %v1542_v23 = vmov 7   ;;  %v537_v38 = vlaneseq  ;;  %vm608_vm3 = vcmask 1039360   ;;  %vm657_vm4 = vcmask 1031168   ;;  %s1362_s27 = smul.u32 384, %s1522_s16 }
  0x1a   : > { %626 = vperm.xlu0 %1438, %v1671_v3   ;;  %s398_s22 = scalar_lea.vmem %s2110_s0, %s1361_s30  ;;  %v969_v24 = vld [vmem:[%s2101_s5 + $0x8] sm:$0xff]  ;;  %v535_v43 = vld [vmem:[%s2097_s1] sm:$0x7]  ;;  %s1545_s30 = smov 110   ;;  %vm706_vm5 = vcmask 900096   ;;  %vm755_vm6 = vcmask 891904  }
  0x1b   : > { %v405_v6 = vld [vmem:[%s398_s22 + $0x8] sm:$0xf]  ;;  %v404_v7 = vld [vmem:[%s398_s22] sm:$0xff]  ;;  %v538_v39 = vshrl.u32 %v537_v38, 7  ;;  %s1550_s22 = smov 90   ;;  %vm804_vm7 = vcmask 883712  }
  0x1c   : > { %v1681_v8 = vpack.c.bf16 %v405_v6, %v405_v6  ;;  %v407_v9 = vcombine.high %v404_v7, %v404_v7  ;;  %v1683_v10 = vpack.c.bf16 %v404_v7, %v404_v7  ;;  %vm853_vm8 = vcmask 752640  }
  0x1d   : > { %581 = vperm.xlu1 %1437, %v559_v5   ;;  %v547_v42 = vsub.s32 2, %v538_v39  ;;  %v539_v44 = vsub.s32 0, %v538_v39  ;;  %v543_v50 = vsub.s32 1, %v538_v39  ;;  %vm902_vm9 = vcmask 744448  }
  0x1e   : > { %1441 = vset.pattern.permute.xlu0 %v1537_v11  ;;  %v443_v12 = vsel %vm435_vm1, %v1681_v8, 0  ;;  %v1687_v13 = vpack.c.bf16 %v407_v9, %v407_v9  ;;  %v437_v14 = vsel %vm435_vm1, %v1683_v10, 0  ;;  %vm1002_vm10 = vcmask 130048  }
  0x1f   : > { %679 = vperm.xlu0 %1441, %v559_v5   ;;  %1343 = vmatpush3.bf16.msra.mxu1 %v443_v12  ;;  %v1756_v48 = vrot.slane %v535_v43, %v547_v42  ;;  %v1760_v55 = vrot.slane %v535_v43, %v539_v44  ;;  %v1765_v61 = vrot.slane %v535_v43, %v543_v50  ;;  %vm951_vm11 = vcmask 736256  }
  0x20   : > { %1325 = vmatprep.subr.msk.bf16.mxu0 %vm435_vm1, %v1687_v13  ;;  %1348 = vmatprep.subr.bf16.mxu1 %v1532_v0  ;;  %vm1204_vm12 = vcmask 261120  }
  0x21   : > { %1439 = vset.pattern.permute.xlu1 %v1536_v4  ;;  %460 = vmatpush1.bf16.msra.mxu0 %v437_v14 }
  0x22   : > { %630 = vperm.xlu1 %1439, %v559_v5   ;;  %1345 = vmatmul.mubr.msk.bf16.vlgmr.msra.gmra.mxu1 %vm431_vm2, %v1453_v15 }
  0x23   : > { %1443 = vset.pattern.permute.xlu0 %v1538_v16  ;;  %1350 = vmatprep.mubr.msk.bf16.mxu1 %vm1533_vm0, %v1532_v0 }
  0x24   : > { %773 = vperm.xlu0 %1443, %v1671_v3   ;;  %1326 = vmatmul.mubr.msk.bf16.vlgmr.msra.gmra.mxu0 %vm431_vm2, %v1453_v15 }
  0x25   : > { %1038 = vmatprep.mubr.bf16.mxu0 %v1534_v1 }
  0x26   : > { %1440 = vset.pattern.permute.xlu1 %v1537_v11 }
  0x27   : > { %675 = vperm.xlu1 %1440, %v1671_v3  }
  0x28   : > { %1446 = vset.pattern.permute.xlu0 %v1539_v17 }
  0x29   : > { %826 = vperm.xlu0 %1446, %v559_v5  }
  0x2b   : > { %1442 = vset.pattern.permute.xlu1 %v1540_v18 }
  0x2c   : > { %724 = vperm.xlu1 %1442, %v1671_v3  }
  0x2d   : > { %1448 = vset.pattern.permute.xlu0 %v1541_v19 }
  0x2e   : > { %920 = vperm.xlu0 %1448, %v1671_v3  }
  0x30   : > { %728 = vperm.xlu1 %1442, %v559_v5  }
  0x32   : > { %1449 = vset.pattern.permute.xlu0 %v1534_v1 }
  0x33   : > { %418 = vperm.xlu0 %1449, %v414_v20  }
  0x34   : > { %1444 = vset.pattern.permute.xlu1 %v1538_v16 }
  0x35   : > { %777 = vperm.xlu1 %1444, %v559_v5  }
  0x37   : > { %423 = vperm.xlu0 %1449, %v415_v21  }
  0x39   : > { %1445 = vset.pattern.permute.xlu1 %v1539_v17 }
  0x3a   : > { %822 = vperm.xlu1 %1445, %v1671_v3  }
  0x3b   : > { %567 = vperm.xlu0 %1449, %v559_v5  }
  0x3e   : > { %1447 = vset.pattern.permute.xlu1 %v1542_v23 }
  0x3f   : > { %871 = vperm.xlu1 %1447, %v1671_v3   ;;  %972 = vperm.xlu0 %1449, %v968_v22  }
  0x43   : > { %875 = vperm.xlu1 %1447, %v559_v5  }
  0x47   : > { %1450 = vset.pattern.permute.xlu1 %v1541_v19 }
  0x48   : > { %924 = vperm.xlu1 %1450, %v559_v5  }
  0x4c   : > { %1451 = vset.pattern.permute.xlu1 %v1534_v1 }
  0x4d   : > { %562 = vperm.xlu1 %1451, %v1671_v3  }
  0x51   : > { %977 = vperm.xlu1 %1451, %v969_v24  }
  0x94   : > { %v1723_v25 = vpop.permute.xlu1 %577 }
  0x95   : > { %v1733_v30 = vpop.permute.xlu0 %626 }
  0x98   : > { %v1725_v26 = vpop.permute.xlu1 %581 }
  0x9a   : > { %v1737_v32 = vpop.permute.xlu0 %679 }
  0x9d   : > { %v1727_v27 = vpop.permute.xlu1 %630 }
  0x9f   : > { %v1741_v34 = vpop.permute.xlu0 %773 }
  0xa2   : > { %v1729_v28 = vpop.permute.xlu1 %675 }
  0xa4   : > { %v1745_v36 = vpop.permute.xlu0 %826 }
  0xa7   : > { %v1731_v29 = vpop.permute.xlu1 %724 }
  0xa9   : > { %v1749_v40 = vpop.permute.xlu0 %920 }
  0xab   : > { %v1735_v31 = vpop.permute.xlu1 %728 }
  0xae   : > { %v419_v45 = vpop.permute.xlu0 %418 }
  0xb0   : > { %v1739_v33 = vpop.permute.xlu1 %777 }
  0xb2   : > { %v424_v22 = vpop.permute.xlu0 %423 }
  0xb5   : > { %v1743_v35 = vpop.permute.xlu1 %822 }
  0xba   : > { %v1747_v37 = vpop.permute.xlu1 %871 }
  0xbe   : > { %v1751_v41 = vpop.permute.xlu1 %875 }
  0xc3   : > { %v1758_v49 = vpop.permute.xlu1 %924 }
  0xc8   : > { %v1770_v3 = vpop.permute.xlu1 %562 }
  0xe2   : > { %v522_v46 = vpop.f32.mrf.mxu1 }
  0xe3   : > { %v523_v47 = vadd.f32 %v522_v46, %v419_v45 }
  0xe4   : > { %v479_v51 = vpop.f32.mrf.mxu0  ;;  %v1346_v52 = vpop.f32.mrf.mxu1 }
  0xe5   : > { %v531_v53 = vmax.f32 %v523_v47, 0.0  ;;  %v480_v54 = vadd.f32 %v479_v51, %v419_v45 }
  0xe6   : > { %v481_v56 = vpop.f32.mrf.mxu0  ;;  %v525_v57 = vpop.f32.mrf.mxu1 }
  0xe7   : > { %v1763_v58 = vmul.f32 %v1756_v48, %v531_v53  ;;  %v529_v59 = vmax.f32 %v480_v54, 0.0  ;;  %v482_v60 = vadd.f32 %v481_v56, %v419_v45  ;;  %v526_v23 = vadd.f32 %v525_v57, %v424_v22 }
  0xe8   : > { %v1347_v62 = vpop.f32.mrf.mxu1 }
  0xe9   : > { %v1768_v63 = vmul.f32 %v1760_v55, %v529_v59  ;;  %v530_v2 = vmax.f32 %v482_v60, 0.0  ;;  %v586_v4 = vmul.f32 %v1723_v25, %v1763_v58  ;;  %v635_v11 = vmul.f32 %v1733_v30, %v1763_v58 }
  0xea   : > { %v684_v14 = vmul.f32 %v1729_v28, %v1763_v58  ;;  %v733_v16 = vmul.f32 %v1731_v29, %v1763_v58  ;;  %v782_v18 = vmul.f32 %v1741_v34, %v1763_v58  ;;  %v831_v20 = vmul.f32 %v1743_v35, %v1763_v58 }
  0xeb   : > { %v1775_v5 = vmul.f32 %v1765_v61, %v530_v2  ;;  %v1779_v6 = vmul.f32 %v1770_v3, %v1768_v63  ;;  %600 = vrot.lane.b32.xlu1 %v586_v4, %s1543_s28  ;;  %v584_v7 = vmul.f32 %v1723_v25, %v1768_v63  ;;  %v633_v12 = vmul.f32 %v1733_v30, %v1768_v63 }
  0xec   : > { %v682_v15 = vmul.f32 %v1729_v28, %v1768_v63  ;;  %v731_v17 = vmul.f32 %v1731_v29, %v1768_v63  ;;  %v780_v19 = vmul.f32 %v1741_v34, %v1768_v63  ;;  %v829_v21 = vmul.f32 %v1743_v35, %v1768_v63 }
  0xed   : > { %v1786_v9 = vmul.f32 %v1770_v3, %v1775_v5  ;;  %596 = vrot.lane.b32.xlu0 %v584_v7, %s1543_s28  ;;  %v880_v24 = vmul.f32 %v1747_v37, %v1763_v58  ;;  %v878_v38 = vmul.f32 %v1747_v37, %v1768_v63  ;;  %v534_v39 = vmax.f32 %v526_v23, 0.0 }
  0xee   : > { %v929_v42 = vmul.f32 %v1749_v40, %v1763_v58  ;;  %v634_v43 = vmul.f32 %v1733_v30, %v1775_v5  ;;  %v585_v45 = vmul.f32 %v1723_v25, %v1775_v5  ;;  %v683_v46 = vmul.f32 %v1729_v28, %v1775_v5 }
  0xef   : > { %649 = vrot.lane.b32.xlu1 %v635_v11, %s1544_s29  ;;  %v1831_v44 = vmul.f32 %v1756_v48, %v534_v39  ;;  %v732_v30 = vmul.f32 %v1731_v29, %v1775_v5  ;;  %v483_v48 = vpop.f32.mrf.mxu0  ;;  %v781_v28 = vmul.f32 %v1741_v34, %v1775_v5  ;;  %v830_v29 = vmul.f32 %v1743_v35, %v1775_v5 }
  0xf0   : > { %v879_v34 = vmul.f32 %v1747_v37, %v1775_v5  ;;  %v928_v35 = vmul.f32 %v1749_v40, %v1775_v5  ;;  %v484_v59 = vadd.f32 %v483_v48, %v424_v22 }
  0xf1   : > { %645 = vrot.lane.b32.xlu0 %v633_v12, %s1544_s29  ;;  %v589_v47 = vmul.f32 %v1725_v26, %v1831_v44  ;;  %v638_v25 = vmul.f32 %v1727_v27, %v1831_v44  ;;  %v485_v50 = vpop.f32.mrf.mxu0  ;;  %v687_v51 = vmul.f32 %v1737_v32, %v1831_v44  ;;  %v736_v53 = vmul.f32 %v1735_v31, %v1831_v44 }
  0xf2   : > { %v486_v52 = vadd.f32 %v485_v50, %v424_v22  ;;  %v785_v56 = vmul.f32 %v1739_v33, %v1831_v44  ;;  %v834_v60 = vmul.f32 %v1745_v36, %v1831_v44  ;;  %v532_v62 = vmax.f32 %v484_v59, 0.0 }
  0xf3   : > { %698 = vrot.lane.b32.xlu1 %v684_v14, %s1545_s30  ;;  %v932_v5 = vmul.f32 %v1758_v49, %v1831_v44 }
  0xf4   : > { %v533_v54 = vmax.f32 %v486_v52, 0.0  ;;  %v1885_v4 = vmul.f32 %v1760_v55, %v532_v62 }
  0xf5   : > { %694 = vrot.lane.b32.xlu0 %v682_v15, %s1545_s30 }
  0xf6   : > { %v1867_v57 = vmul.f32 %v1765_v61, %v533_v54  ;;  %v883_v61 = vmul.f32 %v1751_v41, %v1831_v44  ;;  %v587_v11 = vmul.f32 %v1725_v26, %v1885_v4  ;;  %v636_v12 = vmul.f32 %v1727_v27, %v1885_v4 }
  0xf7   : > { %747 = vrot.lane.b32.xlu1 %v733_v16, %s1546_s11 }
  0xf8   : > { %v588_v37 = vmul.f32 %v1725_v26, %v1867_v57  ;;  %v637_v2 = vmul.f32 %v1727_v27, %v1867_v57  ;;  %v686_v7 = vmul.f32 %v1737_v32, %v1867_v57  ;;  %v735_v55 = vmul.f32 %v1735_v31, %v1867_v57 }
  0xf9   : > { %743 = vrot.lane.b32.xlu0 %v731_v17, %s1546_s11  ;;  %v784_v14 = vmul.f32 %v1739_v33, %v1867_v57  ;;  %v685_v26 = vmul.f32 %v1737_v32, %v1885_v4  ;;  %v833_v15 = vmul.f32 %v1745_v36, %v1867_v57  ;;  %v734_v27 = vmul.f32 %v1735_v31, %v1885_v4 }
  0xfa   : > { %v882_v16 = vmul.f32 %v1751_v41, %v1867_v57  ;;  %v783_v32 = vmul.f32 %v1739_v33, %v1885_v4  ;;  %v931_v17 = vmul.f32 %v1758_v49, %v1867_v57  ;;  %v832_v31 = vmul.f32 %v1745_v36, %v1885_v4  ;;  %v1088_v36 = vld [vmem:[%s2105_s9] sm:$0xff] }
  0xfb   : > { %796 = vrot.lane.b32.xlu1 %v782_v18, %s1547_s12  ;;  %v927_v18 = vmul.f32 %v1749_v40, %v1768_v63  ;;  %v881_v33 = vmul.f32 %v1751_v41, %v1885_v4  ;;  %v996_v40 = vld [vmem:[%s2103_s7] sm:$0xff]  ;;  %v1950_v41 = vpop.permute.xlu1 %977 }
  0xfd   : > { %792 = vrot.lane.b32.xlu0 %v780_v19, %s1547_s12  ;;  %v930_v19 = vmul.f32 %v1758_v49, %v1885_v4 }
  0xff   : > { %845 = vrot.lane.b32.xlu1 %v831_v20, %s1548_s19 }
 0x101   : > { %841 = vrot.lane.b32.xlu0 %v829_v21, %s1548_s19 }
 0x103   : > { %894 = vrot.lane.b32.xlu1 %v880_v24, %s1549_s20 }
 0x105   : > { %890 = vrot.lane.b32.xlu0 %v878_v38, %s1549_s20 }
 0x107   : > { %943 = vrot.lane.b32.xlu1 %v929_v42, %s1550_s22 }
 0x109   : > { %647 = vrot.lane.b32.xlu0 %v634_v43, %s1544_s29 }
 0x10b   : > { %598 = vrot.lane.b32.xlu1 %v585_v45, %s1543_s28 }
 0x10d   : > { %696 = vrot.lane.b32.xlu0 %v683_v46, %s1545_s30 }
 0x10f   : > { %606 = vrot.lane.b32.xlu1 %v589_v47, %s1543_s28 }
 0x111   : > { %745 = vrot.lane.b32.xlu0 %v732_v30, %s1546_s11 }
 0x113   : > { %655 = vrot.lane.b32.xlu1 %v638_v25, %s1544_s29 }
 0x115   : > { %794 = vrot.lane.b32.xlu0 %v781_v28, %s1547_s12 }
 0x117   : > { %704 = vrot.lane.b32.xlu1 %v687_v51, %s1545_s30 }
 0x119   : > { %843 = vrot.lane.b32.xlu0 %v830_v29, %s1548_s19 }
 0x11b   : > { %753 = vrot.lane.b32.xlu1 %v736_v53, %s1546_s11 }
 0x11d   : > { %892 = vrot.lane.b32.xlu0 %v879_v34, %s1549_s20 }
 0x11f   : > { %802 = vrot.lane.b32.xlu1 %v785_v56, %s1547_s12 }
 0x121   : > { %941 = vrot.lane.b32.xlu0 %v928_v35, %s1550_s22 }
 0x123   : > { %851 = vrot.lane.b32.xlu1 %v834_v60, %s1548_s19 }
 0x125   : > { %604 = vrot.lane.b32.xlu0 %v588_v37, %s1543_s28 }
 0x127   : > { %900 = vrot.lane.b32.xlu1 %v883_v61, %s1549_s20 }
 0x129   : > { %653 = vrot.lane.b32.xlu0 %v637_v2, %s1544_s29 }
 0x12b   : > { %949 = vrot.lane.b32.xlu1 %v932_v5, %s1550_s22 }
 0x12d   : > { %702 = vrot.lane.b32.xlu0 %v686_v7, %s1545_s30 }
 0x12f   : > { %602 = vrot.lane.b32.xlu1 %v587_v11, %s1543_s28 }
 0x131   : > { %751 = vrot.lane.b32.xlu0 %v735_v55, %s1546_s11 }
 0x133   : > { %651 = vrot.lane.b32.xlu1 %v636_v12, %s1544_s29 }
 0x135   : > { %800 = vrot.lane.b32.xlu0 %v784_v14, %s1547_s12 }
 0x137   : > { %700 = vrot.lane.b32.xlu1 %v685_v26, %s1545_s30 }
 0x139   : > { %849 = vrot.lane.b32.xlu0 %v833_v15, %s1548_s19  ;;  %v572_v15 = vmul.f32 %v1770_v3, %v1763_v58 }
 0x13b   : > { %749 = vrot.lane.b32.xlu1 %v734_v27, %s1546_s11 }
 0x13d   : > { %898 = vrot.lane.b32.xlu0 %v882_v16, %s1549_s20 }
 0x13f   : > { %798 = vrot.lane.b32.xlu1 %v783_v32, %s1547_s12 }
 0x141   : > { %947 = vrot.lane.b32.xlu0 %v931_v17, %s1550_s22 }
 0x143   : > { %847 = vrot.lane.b32.xlu1 %v832_v31, %s1548_s19  ;;  %s1551_s19 = smov [#allocation2]  }
 0x145   : > { %939 = vrot.lane.b32.xlu0 %v927_v18, %s1550_s22 }
 0x147   : > { %896 = vrot.lane.b32.xlu1 %v881_v33, %s1549_s20  ;;  %s387_s20 = sand.u32 1, %s1514_s14  }
 0x148   : > { %s1207_s12 = scalar_lea.sflag [#allocation3], %s387_s20 }
 0x149   : > { %1097 = vrot.lane.b32.xlu0 %v1683_v10, %s1546_s11  ;;  %v1948_v10 = vpop.permute.xlu0 %567 }
 0x14a   : > { %v575_v33 = vmul.f32 %v1948_v10, %v1831_v44 }
 0x14b   : > { %945 = vrot.lane.b32.xlu1 %v930_v19, %s1550_s22  ;;  %s1360_s22 = smul.u32 24, %s387_s20 }
 0x14d   : > { %1101 = vrot.lane.b32.xlu0 %v1681_v8, %s1546_s11  ;;  %v1952_v49 = vpop.permute.xlu0 %972  ;;  %s389_s24 = scalar_lea.vmem [#allocation2], %s1360_s22  ;;  %s1458_s22 = sshll.u32 %s1551_s19, 4  ;;  %s1459_s22 = int_to_ptr.vmem [resolvable:$false] %s1458_s22 }
 0x14e   : > { %s1223_s28 = sshll.u32 %s389_s24, 4  ;;  %s1460_s0 = scalar_lea.vmem %s1459_s22, 768  ;;  %s1224_s28 = int_to_ptr.vmem [resolvable:$true] %s1223_s28 }
 0x14f   : > { %1099 = vrot.lane.b32.xlu1 %v1687_v13, %s1546_s11  ;;  %s2054_s11 = scalar_lea.hbm %s2106_s10, %s1362_s27  ;;  %s1454_s16 = scalar_lea.vmem %s1224_s28, 384 }
 0x150   : > { %p1455_p12 = scmp.ne.s32.totalorder %s1224_s28, %s1454_s16  ;;  %p1461_p1 = scmp.lt.s32.totalorder %s1224_s28, %s1459_s22 }
 0x151   : > { %1091 = vperm.xlu0 %1449, %v1088_v36   ;;  %p1462_p2 = scmp.lt.s32.totalorder %s1460_s0, %s1454_s16 }
 0x152   : > { %p1456_p13 = pnand %p1455_p12, %p1647_p4 }
 0x153   : > { %999 = vperm.xlu1 %1451, %v996_v40   ;;  %p1463_p3 = por %p1462_p2, %p1461_p1 }
 0x154   : > { %p1457_p0 = pneg %p1456_p13 }
 0x156   : > { %p1464_p5 = pnand %p1463_p3, %p1457_p0 }
 0x15d   : > { %v601_v8 = vpop.permute.xlu1 %600 }
 0x15e   : > { %v621_v16 = vadd.f32 %v601_v8, %v572_v15 }
 0x15f   : > { %v597_v63 = vpop.permute.xlu0 %596 }
 0x161   : > { %v650_v20 = vpop.permute.xlu1 %649 }
 0x162   : > { %v670_v18 = vadd.f32 %v650_v20, %v621_v16 }
 0x163   : > { %v646_v21 = vpop.permute.xlu0 %645 }
 0x165   : > { %v699_v22 = vpop.permute.xlu1 %698 }
 0x166   : > { %v719_v36 = vadd.f32 %v699_v22, %v670_v18 }
 0x167   : > { %v695_v23 = vpop.permute.xlu0 %694 }
 0x169   : > { %v748_v24 = vpop.permute.xlu1 %747 }
 0x16a   : > { %v768_v58 = vadd.f32 %v748_v24, %v719_v36 }
 0x16b   : > { %v744_v13 = vpop.permute.xlu0 %743 }
 0x16d   : > { %v797_v38 = vpop.permute.xlu1 %796 }
 0x16f   : > { %v793_v39 = vpop.permute.xlu0 %792 }
 0x171   : > { %v1954_v42 = vpop.permute.xlu1 %845 }
 0x173   : > { %v842_v43 = vpop.permute.xlu0 %841 }
 0x175   : > { %v1956_v45 = vpop.permute.xlu1 %894 }
 0x177   : > { %v891_v46 = vpop.permute.xlu0 %890 }
 0x179   : > { %v1958_v47 = vpop.permute.xlu1 %943 }
 0x17b   : > { %v648_v30 = vpop.permute.xlu0 %647 }
 0x17c   : > { %v658_v29 = vsel %vm657_vm4, %v646_v21, %v648_v30  ;;  %v659_v53 = vsel %vm657_vm4, %v648_v30, %v650_v20 }
 0x17d   : > { %v599_v48 = vpop.permute.xlu1 %598 }
 0x17e   : > { %v609_v25 = vsel %vm608_vm3, %v597_v63, %v599_v48  ;;  %v610_v28 = vsel %vm608_vm3, %v599_v48, %v601_v8 }
 0x17f   : > { %v619_v50 = vadd.f32 %v609_v25, %v1779_v6  ;;  %v620_v51 = vadd.f32 %v610_v28, %v1786_v9  ;;  %v697_v52 = vpop.permute.xlu0 %696 }
 0x180   : > { %v707_v35 = vsel %vm706_vm5, %v695_v23, %v697_v52  ;;  %v708_v59 = vsel %vm706_vm5, %v697_v52, %v699_v22 }
 0x181   : > { %v669_v54 = vadd.f32 %v659_v53, %v620_v51  ;;  %v668_v34 = vadd.f32 %v658_v29, %v619_v50  ;;  %v607_v56 = vpop.permute.xlu1 %606 }
 0x182   : > { %v624_v40 = vadd.f32 %v607_v56, %v575_v33  ;;  %v573_v33 = vmul.f32 %v1948_v10, %v1885_v4 }
 0x183   : > { %v717_v60 = vadd.f32 %v707_v35, %v668_v34  ;;  %v718_v37 = vadd.f32 %v708_v59, %v669_v54  ;;  %v746_v62 = vpop.permute.xlu0 %745 }
 0x184   : > { %v756_v6 = vsel %vm755_vm6, %v744_v13, %v746_v62  ;;  %v757_v9 = vsel %vm755_vm6, %v746_v62, %v748_v24  ;;  %v817_v13 = vadd.f32 %v797_v38, %v768_v58  ;;  %v574_v62 = vmul.f32 %v1948_v10, %v1867_v57 }
 0x185   : > { %v766_v61 = vadd.f32 %v756_v6, %v717_v60  ;;  %v767_v2 = vadd.f32 %v757_v9, %v718_v37  ;;  %v656_v5 = vpop.permute.xlu1 %655 }
 0x186   : > { %v673_v3 = vadd.f32 %v656_v5, %v624_v40  ;;  %v866_v20 = vadd.f32 %v1954_v42, %v817_v13 }
 0x187   : > { %v795_v7 = vpop.permute.xlu0 %794 }
 0x188   : > { %v805_v11 = vsel %vm804_vm7, %v793_v39, %v795_v7  ;;  %v806_v55 = vsel %vm804_vm7, %v795_v7, %v797_v38  ;;  %v915_v44 = vadd.f32 %v1956_v45, %v866_v20 }
 0x189   : > { %v815_v12 = vadd.f32 %v805_v11, %v766_v61  ;;  %v1972_v14 = vadd.f32 %v806_v55, %v767_v2  ;;  %v705_v26 = vpop.permute.xlu1 %704  ;;  %v1996_v61 = vld [vmem:[%s2102_s6] sm:$0xf] }
 0x18a   : > { %v722_v39 = vadd.f32 %v705_v26, %v673_v3 }
 0x18b   : > { %v844_v27 = vpop.permute.xlu0 %843 }
 0x18c   : > { %v854_v32 = vsel %vm853_vm8, %v842_v43, %v844_v27 }
 0x18d   : > { %v864_v17 = vadd.f32 %v854_v32, %v815_v12  ;;  %v754_v31 = vpop.permute.xlu1 %753 }
 0x18e   : > { %v771_v30 = vadd.f32 %v754_v31, %v722_v39 }
 0x18f   : > { %v893_v19 = vpop.permute.xlu0 %892 }
 0x190   : > { %v903_v63 = vsel %vm902_vm9, %v891_v46, %v893_v19  ;;  %v964_v46 = vadd.f32 %v1958_v47, %v915_v44  ;;  %v904_v16 = vsel %vm902_vm9, %v893_v19, %v1956_v45 }
 0x191   : > { %v1980_v21 = vadd.f32 %v903_v63, %v864_v17  ;;  %v803_v23 = vpop.permute.xlu1 %802 }
 0x192   : > { %v820_v22 = vadd.f32 %v803_v23, %v771_v30  ;;  %v982_v52 = vadd.f32 %v1952_v49, %v964_v46 }
 0x193   : > { %v1982_v8 = vpop.permute.xlu0 %941 }
 0x194   : > { %v988_v34 = vmax.f32 %v982_v52, 0.0 }
 0x195   : > { %v852_v43 = vpop.permute.xlu1 %851 }
 0x196   : > { %v869_v28 = vadd.f32 %v852_v43, %v820_v22 }
 0x197   : > { %v605_v48 = vpop.permute.xlu0 %604 }
 0x198   : > { %v612_v60 = vsel %vm608_vm3, %v605_v48, %v607_v56 }
 0x199   : > { %v901_v25 = vpop.permute.xlu1 %900  ;;  %v623_v2 = vadd.f32 %v612_v60, %v574_v62 }
 0x19a   : > { %v918_v51 = vadd.f32 %v901_v25, %v869_v28 }
 0x19b   : > { %v654_v50 = vpop.permute.xlu0 %653 }
 0x19c   : > { %v661_v9 = vsel %vm657_vm4, %v654_v50, %v656_v5  ;;  %v855_v5 = vsel %vm853_vm8, %v844_v27, %v1954_v42  ;;  %v953_v42 = vsel %vm951_vm11, %v1982_v8, %v1958_v47 }
 0x19d   : > { %v950_v24 = vpop.permute.xlu1 %949  ;;  %v672_v11 = vadd.f32 %v661_v9, %v623_v2  ;;  %v865_v32 = vadd.f32 %v855_v5, %v1972_v14 }
 0x19e   : > { %v967_v29 = vadd.f32 %v950_v24, %v918_v51 }
 0x19f   : > { %v703_v38 = vpop.permute.xlu0 %702 }
 0x1a0   : > { %v985_v53 = vadd.f32 %v1950_v41, %v967_v29  ;;  %v710_v56 = vsel %vm706_vm5, %v703_v38, %v705_v26 }
 0x1a1   : > { %v603_v54 = vpop.permute.xlu1 %602  ;;  %v721_v12 = vadd.f32 %v710_v56, %v672_v11 }
 0x1a2   : > { %v991_v35 = vmax.f32 %v985_v53, 0.0  ;;  %v611_v27 = vsel %vm608_vm3, %v603_v54, %v605_v48 }
 0x1a3   : > { %v752_v59 = vpop.permute.xlu0 %751  ;;  %v622_v63 = vadd.f32 %v611_v27, %v573_v33 }
 0x1a4   : > { %v995_v37 = vpack.c.bf16 %v991_v35, %v988_v34  ;;  %v759_v55 = vsel %vm755_vm6, %v752_v59, %v754_v31  ;;  %v914_v31 = vadd.f32 %v904_v16, %v865_v32 }
 0x1a5   : > { %v652_v6 = vpop.permute.xlu1 %651  ;;  %v770_v17 = vadd.f32 %v759_v55, %v721_v12 }
 0x1a6   : > { %1349 = vmatpush3.bf16.msra.mxu1 %v995_v37  ;;  %v660_v19 = vsel %vm657_vm4, %v652_v6, %v654_v50  ;;  %v963_v40 = vadd.f32 %v953_v42, %v914_v31 }
 0x1a7   : > { %v801_v7 = vpop.permute.xlu0 %800  ;;  %1354 = vmatprep.subr.bf16.mxu1 %v1532_v0  ;;  %v671_v3 = vadd.f32 %v660_v19, %v622_v63 }
 0x1a8   : > { %v808_v26 = vsel %vm804_vm7, %v801_v7, %v803_v23  ;;  %v981_v4 = vadd.f32 %v1952_v49, %v963_v40 }
 0x1a9   : > { %1351 = vmatmul.mubr.msk.bf16.vlgmr.msra.gmra.mxu1 %vm1002_vm10, %v1996_v61  ;;  %v701_v57 = vpop.permute.xlu1 %700  ;;  %v819_v36 = vadd.f32 %v808_v26, %v770_v17 }
 0x1aa   : > { %1356 = vmatprep.mubr.msk.bf16.mxu1 %vm1533_vm0, %v1532_v0  ;;  %v709_v47 = vsel %vm706_vm5, %v701_v57, %v703_v38  ;;  %v987_v51 = vmax.f32 %v981_v4, 0.0 }
 0x1ab   : > { %v850_v15 = vpop.permute.xlu0 %849  ;;  %v720_v10 = vadd.f32 %v709_v47, %v671_v3 }
 0x1ac   : > { %v857_v0 = vsel %vm853_vm8, %v850_v15, %v852_v43 }
 0x1ad   : > { %v750_v18 = vpop.permute.xlu1 %749  ;;  %v868_v23 = vadd.f32 %v857_v0, %v819_v36 }
 0x1ae   : > { %v758_v43 = vsel %vm755_vm6, %v750_v18, %v752_v59 }
 0x1af   : > { %v899_v45 = vpop.permute.xlu0 %898  ;;  %v769_v22 = vadd.f32 %v758_v43, %v720_v10 }
 0x1b0   : > { %v906_v14 = vsel %vm902_vm9, %v899_v45, %v901_v25 }
 0x1b1   : > { %v799_v58 = vpop.permute.xlu1 %798  ;;  %v917_v13 = vadd.f32 %v906_v14, %v868_v23 }
 0x1b2   : > { %v807_v44 = vsel %vm804_vm7, %v799_v58, %v801_v7 }
 0x1b3   : > { %v948_v39 = vpop.permute.xlu0 %947  ;;  %v818_v52 = vadd.f32 %v807_v44, %v769_v22 }
 0x1b4   : > { %v955_v20 = vsel %vm951_vm11, %v948_v39, %v950_v24 }
 0x1b5   : > { %v966_v30 = vadd.f32 %v955_v20, %v917_v13  ;;  %v848_v48 = vpop.permute.xlu1 %847 }
 0x1b6   : > { %v856_v28 = vsel %vm853_vm8, %v848_v48, %v850_v15 }
 0x1b7   : > { %v984_v25 = vadd.f32 %v1950_v41, %v966_v30  ;;  %v940_v46 = vpop.permute.xlu0 %939  ;;  %v867_v53 = vadd.f32 %v856_v28, %v818_v52 }
 0x1b8   : > { %v952_v50 = vsel %vm951_vm11, %v940_v46, %v1982_v8 }
 0x1b9   : > { %v990_v29 = vmax.f32 %v984_v25, 0.0  ;;  %v897_v24 = vpop.permute.xlu1 %896  ;;  %v962_v54 = vadd.f32 %v952_v50, %v1980_v21  ;;  %v1087_v21 = vld [vmem:[%s2104_s8] sm:$0xf] }
 0x1ba   : > { %v905_v38 = vsel %vm902_vm9, %v897_v24, %v899_v45 }
 0x1bb   : > { %v1098_v34 = vpop.permute.xlu0 %1097  ;;  %v994_v35 = vpack.c.bf16 %v990_v29, %v987_v51  ;;  %v916_v59 = vadd.f32 %v905_v38, %v867_v53  ;;  %v980_v62 = vadd.f32 %v1952_v49, %v962_v54 }
 0x1bd   : > { %v946_v60 = vpop.permute.xlu1 %945  ;;  %1020 = vmatprep.subr.bf16.mxu0 %v994_v35  ;;  %v986_v56 = vmax.f32 %v980_v62, 0.0 }
 0x1be   : > { %v954_v37 = vsel %vm951_vm11, %v946_v60, %v948_v39 }
 0x1bf   : > { %v965_v6 = vadd.f32 %v954_v37, %v916_v59  ;;  %v1102_v8 = vpop.permute.xlu0 %1101 }
 0x1c0   : > { %v1116_v9 = vsel %vm435_vm1, %v1102_v8, 0 }
 0x1c1   : > { %v983_v2 = vadd.f32 %v1950_v41, %v965_v6  ;;  %1355 = vmatpush3.bf16.msra.mxu1 %v1116_v9  ;;  %v1100_v7 = vpop.permute.xlu1 %1099 }
 0x1c2   : > { %v1104_v49 = vsel %vm755_vm6, %v1098_v34, %v1100_v7  ;;  %v1105_v5 = vsel %vm755_vm6, %v1100_v7, %v1102_v8 }
 0x1c3   : > { %v989_v11 = vmax.f32 %v983_v2, 0.0  ;;  %v1110_v41 = vsel %vm435_vm1, %v1104_v49, 0 }
 0x1c4   : > { %1357 = vmatmul.mubr.msk.bf16.vlgmr.msra.gmra.mxu1 %vm431_vm2, %v1087_v21 }
 0x1c5   : > { %v993_v57 = vpack.c.bf16 %v989_v11, %v986_v56 }
 0x1c7   : > { %1021 = vmatpush1.bf16.msra.mxu0 %v993_v57 }
 0x1c8   : > { %1330 = vmatprep.subr.msk.bf16.mxu0 %vm435_vm1, %v1105_v5 }
 0x1ca   : > { %1328 = vmatmul.mubr.msk.bf16.vlgmr.msra.gmra.mxu0 %vm1002_vm10, %v1996_v61 }
 0x1cb   : > { %1133 = vmatpush1.bf16.msra.mxu0 %v1110_v41  ;;  %1150 = vmatprep.mubr.bf16.mxu0 %v1534_v1 }
 0x1cc   : > { %v1092_v26 = vpop.permute.xlu0 %1091 }
 0x1ce   : > { %v1000_v32 = vpop.permute.xlu1 %999 }
 0x1d2   : > { %1331 = vmatmul.mubr.msk.bf16.vlgmr.msra.gmra.mxu0 %vm431_vm2, %v1087_v21 }
 0x269   : > { %v1081_v55 = vpop.f32.mrf.mxu1 }
 0x26a   : > { %v1082_v18 = vadd.f32 %v1081_v55, %v1000_v32 }
 0x26b   : > { %v1352_v12 = vpop.f32.mrf.mxu1 }
 0x26d   : > { %v1084_v15 = vpop.f32.mrf.mxu1 }
 0x26f   : > { %v1353_v16 = vpop.f32.mrf.mxu1 }
 0x284   : > { %v1193_v17 = vpop.f32.mrf.mxu1 }
 0x285   : > { %v1194_v42 = vadd.f32 %v1193_v17, %v1092_v26 }
 0x286   : > { %v1358_v61 = vpop.f32.mrf.mxu1 }
 0x287   : > { %v1201_v27 = vadd.f32 %v1194_v42, %v1082_v18 }
 0x288   : > { %v1196_v0 = vpop.f32.mrf.mxu1 }
 0x289   : > { %1205 = vst.msk [vmem:[%s389_s24 + $0x10] sm:$0xff] %vm1204_vm12, %v1201_v27 }
 0x28a   : > { %v1040_v1 = vpop.f32.mrf.mxu0  ;;  %v1359_v31 = vpop.f32.mrf.mxu1 }
 0x28b   : > { %v1041_v14 = vadd.f32 %v1040_v1, %v1000_v32 }
 0x28c   : > { %v1042_v33 = vpop.f32.mrf.mxu0 }
 0x28d   : > { %v1043_v23 = vadd.f32 %v1042_v33, %v1000_v32 }
 0x28e   : > { %v1044_v36 = vpop.f32.mrf.mxu0 }
 0x290   : > { %v1045_v45 = vpop.f32.mrf.mxu0 }
 0x292   : > { %v1152_v19 = vpop.f32.mrf.mxu0 }
 0x293   : > { %v1153_v40 = vadd.f32 %v1152_v19, %v1092_v26 }
 0x294   : > { %v1154_v63 = vpop.f32.mrf.mxu0 }
 0x295   : > { %v1199_v58 = vadd.f32 %v1153_v40, %v1041_v14  ;;  %v1155_v47 = vadd.f32 %v1154_v63, %v1092_v26 }
 0x296   : > { %v1156_v3 = vpop.f32.mrf.mxu0 }
 0x297   : > { %1202 = vst [vmem:[%s389_s24] sm:$0xff] %v1199_v58  ;;  %v1200_v13 = vadd.f32 %v1155_v47, %v1043_v23 }
 0x298   : > { %v1157_v39 = vpop.f32.mrf.mxu0 }
 0x299   : > { %1203 = vst [vmem:[%s389_s24 + $0x8] sm:$0xff] %v1200_v13 }
 0x29a   : > { %1467 = shalt.err (!%p1464_p5)
}
 0x29b   : > { %s1468_s24 = scalar_lea.hbm %s2054_s11, 384  ;;  %s1472_s29 = scalar_lea.hbm %s2106_s10, 768 }
 0x29c   : > { %p1469_p6 = scmp.ne.s32.totalorder %s2054_s11, %s1468_s24  ;;  %p1473_p10 = scmp.lt.s32.totalorder %s2054_s11, %s2106_s10 }
 0x29d   : > { %p1474_p11 = scmp.lt.s32.totalorder %s1472_s29, %s1468_s24 }
 0x29e   : > { %p1470_p7 = pnand %p1469_p6, %p1647_p4 }
 0x29f   : > { %p1475_p12 = por %p1474_p11, %p1473_p10 }
 0x2a0   : > { %p1471_p9 = pneg %p1470_p7 }
 0x2a2   : > { %p1476_p13 = pnand %p1475_p12, %p1471_p9 }
 0x2a4   : > { %1479 = shalt.err (!%p1476_p13)
}
 0x2a5   : > { %1363 = dma.vmem_to_hbm [thread:$0]  (%p1647_p4), %s1224_s28, 384, %s2054_s11, %s1207_s12  }
 0x2a6 PF: > { %p1369_p0 = scmp.ge.s32.totalorder %s1530_s18, 2  ;;  %s1235_s0 = sand.u32 1, %s1510_s13  }
 0x2a7   : > { %s1236_s16 = scalar_lea.sflag [#allocation3], %s1235_s0 }
 0x2a8   : > { %p1366_p1 = pnand %p1369_p0, %p1654_p8 }
 0x2aa   : > { %p1367_p2 = pneg %p1366_p1 }
 0x2ac   : > { %1505 = dma.done.wait (%p1367_p2), %s1236_s16, 384  }
 0x2ad   : > { %1507 = vsyncadd (%p1367_p2), %s1236_s16, 4294966912  ;;  %s23_s18 = sadd.s32 1, %s1530_s18   ;;  %s2111_s13 = smov %s1514_s14 }
 0x2ae   : > { %p20_p3 = scmp.ge.s32.totalorder %s23_s18, 4   ;;  %s2112_s14 = smov %s1518_s15 }
 0x2af   : > { %s2113_s15 = smov %s1660_s26  ;;  %s2114_s16 = smov %s1526_s17 }
 0x2b0   : > { %s2115_s17 = smov %s2117_s21  ;;  %22 = sbr.rel (!%p20_p3) target bundleno = 6 (0x6), region = 98 }
 0x2b5   :  { %1241 = vsyncpa [#allocation3], 1 }
 0x2b6   :  { %1243 = vsyncpa [#allocation3 + $0x1], 1 }

</bundles_post_ra>
